<compile_context>
chip_gen: v7x
topology: tpu7x:2x2x1
jax: 0.10.0
libtpu: 0.0.40
codegen_flags: <defaults>
</compile_context>

<pallas_src>
import functools

import jax
import jax.numpy as jnp
from jax.experimental import pallas as pl
from jax.experimental.pallas import tpu as pltpu


def _dice_partial_kernel(x_ref, t_ref, inter_ref, denom_ref, *, d_total, td):
    k = pl.program_id(0)

    x = x_ref[...].astype(jnp.float32)
    t = t_ref[...].astype(jnp.float32)

    if d_total % td != 0:
        # The tail tile's DMA window extends past the array edge; those
        # columns hold unspecified data, so mask them before accumulating.
        col = jax.lax.broadcasted_iota(jnp.int32, x.shape, 1)
        valid = col < (d_total - k * td)
        x = jnp.where(valid, x, 0.0)
        t = jnp.where(valid, t, 0.0)

    # Per-sample partial sums over this D-tile (written as lane-small partial
    # outputs; the final reduction over tiles happens in the JAX wrapper).
    inter_ref[...] = jnp.sum(x * t, axis=1, keepdims=True)
    denom_ref[...] = jnp.sum(x + t, axis=1, keepdims=True)


def dice_loss(inp, target, smooth=1.0, *, max_block_bytes=16 * 1024 * 1024):
    n = inp.shape[0]
    x = inp.reshape(n, -1)       # free reshape, no HBM copy
    t = target.reshape(n, -1)
    # Keep native dtypes (bf16/int read half/quarter the bytes); only bool is
    # promoted host-side since packed i1 blocks don't stream well.
    if x.dtype == jnp.bool_:
        x = x.astype(jnp.float32)
    if t.dtype == jnp.bool_:
        t = t.astype(jnp.float32)
    d = x.shape[1]

    # VMEM-budgeted D tile: 2 inputs x 2 pipeline buffers under
    # `max_block_bytes` (VMEM pads the sublane dim to a multiple of 8).
    n_sub = max(8, ((n + 7) // 8) * 8)
    itemsize = max(x.dtype.itemsize, t.dtype.itemsize)
    td_cap = max_block_bytes // (2 * 2 * n_sub * itemsize)
    td_cap = max(128, (td_cap // 128) * 128)

    if d <= td_cap:
        td = d            # full-dim block: exempt from the 128 constraint
    else:
        td = td_cap       # multiple of 128; tail tile masked in kernel
    grid_d = pl.cdiv(d, td)

    kernel = functools.partial(_dice_partial_kernel, d_total=d, td=td)

    inter_p, denom_p = pl.pallas_call(
        kernel,
        out_shape=(
            jax.ShapeDtypeStruct((grid_d, n, 1), jnp.float32),
            jax.ShapeDtypeStruct((grid_d, n, 1), jnp.float32),
        ),
        grid_spec=pltpu.PrefetchScalarGridSpec(
            num_scalar_prefetch=0,
            grid=(grid_d,),
            in_specs=[
                pl.BlockSpec((n, td), lambda k: (0, k)),
                pl.BlockSpec((n, td), lambda k: (0, k)),
            ],
            out_specs=[
                pl.BlockSpec((None, n, 1), lambda k: (k, 0, 0)),
                pl.BlockSpec((None, n, 1), lambda k: (k, 0, 0)),
            ],
        ),
        compiler_params=pltpu.CompilerParams(
            dimension_semantics=("parallel",),
            vmem_limit_bytes=32 * 1024 * 1024),
    )(x, t)

    # Tiny host-side reduction over the per-tile partials.
    inter = jnp.sum(inter_p[:, :, 0], axis=0)     # (n,)
    denom = jnp.sum(denom_p[:, :, 0], axis=0)     # (n,)  == xsum + tsum
    dice = 2.0 * (inter + smooth) / (denom + smooth)
    return 1.0 - jnp.sum(dice) / jnp.float32(n)


def dice_loss_ref(inp, target, smooth=1.0):
    n = inp.shape[0]
    x = inp.reshape(n, -1).astype(jnp.float32)
    t = target.reshape(n, -1).astype(jnp.float32)
    inter = jnp.sum(x * t, axis=1)
    dice = 2.0 * (inter + smooth) / (jnp.sum(x, 1) + jnp.sum(t, 1) + smooth)
    return 1.0 - jnp.sum(dice) / n


if __name__ == "__main__":
    key = jax.random.PRNGKey(0)
    k1, k2, k3, k4 = jax.random.split(key, 4)

    # Case 1: NCHW probabilities vs. binary mask, D = 4*16*16 = 1024
    # (single full-width tile, grid of 1).
    x1 = jax.nn.sigmoid(jax.random.normal(k1, (2, 4, 16, 16), dtype=jnp.float32))
    y1 = (jax.random.uniform(k2, (2, 4, 16, 16)) > 0.5).astype(jnp.float32)
    out1 = jax.block_until_ready(dice_loss(x1, y1, smooth=1.0))
    ref1 = dice_loss_ref(x1, y1, smooth=1.0)
    assert jnp.allclose(out1, ref1, atol=1e-5, rtol=1e-5), (out1, ref1)

    # Case 2: non-128-aligned D (3*10*10 = 300) with a tiny forced block
    # budget -> exercises the multi-tile path and the masked tail tile.
    x2 = jax.nn.sigmoid(jax.random.normal(k3, (2, 3, 10, 10), dtype=jnp.float32))
    y2 = (jax.random.uniform(k4, (2, 3, 10, 10)) > 0.5).astype(jnp.float32)
    out2 = jax.block_until_ready(
        dice_loss(x2, y2, smooth=1.0, max_block_bytes=16 * 1024))
    ref2 = dice_loss_ref(x2, y2, smooth=1.0)
    assert jnp.allclose(out2, ref2, atol=1e-5, rtol=1e-5), (out2, ref2)

    print("KERNEL_OK")
</pallas_src>

<mosaic_0001>
module attributes {stable_mosaic.version = 11 : i64} {
  func.func @_dice_partial_kernel(%arg0: i32, %arg1: memref<2x1024xf32, #tpu.memory_space<vmem>>, %arg2: memref<2x1024xf32, #tpu.memory_space<vmem>>, %arg3: memref<1x2x1xf32, #tpu.memory_space<vmem>>, %arg4: memref<1x2x1xf32, #tpu.memory_space<vmem>>) attributes {dimension_semantics = [#tpu.dimension_semantics<parallel>], iteration_bounds = array<i64: 1>, scalar_prefetch = 0 : i64, scratch_operands = 0 : i64, tpu.core_type = #tpu.core_type<tc>, window_params = [{transform_indices = @transform_0, window_bounds = array<i64: 2, 1024>}, {transform_indices = @transform_1, window_bounds = array<i64: 2, 1024>}, {transform_indices = @transform_2, window_bounds = array<i64: 1, 2, 1>}, {transform_indices = @transform_3, window_bounds = array<i64: 1, 2, 1>}]} {
    %c0 = arith.constant 0 : index
    %c0_0 = arith.constant 0 : index
    %0 = vector.load %arg1[%c0, %c0_0] : memref<2x1024xf32, #tpu.memory_space<vmem>>, vector<2x1024xf32>
    %c0_1 = arith.constant 0 : index
    %c0_2 = arith.constant 0 : index
    %1 = vector.load %arg2[%c0_1, %c0_2] : memref<2x1024xf32, #tpu.memory_space<vmem>>, vector<2x1024xf32>
    %2 = arith.mulf %0, %1 : vector<2x1024xf32>
    %cst = arith.constant dense<0.000000e+00> : vector<2xf32>
    %3 = vector.multi_reduction <add>, %2, %cst [1] : vector<2x1024xf32> to vector<2xf32>
    %4 = vector.shape_cast %3 : vector<2xf32> to vector<2x1xf32>
    %c0_3 = arith.constant 0 : index
    %c0_4 = arith.constant 0 : index
    %c0_5 = arith.constant 0 : index
    %5 = vector.load %arg3[%c0_3, %c0_4, %c0_5] : memref<1x2x1xf32, #tpu.memory_space<vmem>>, vector<1x2x1xf32>
    %6 = vector.shape_cast %5 : vector<1x2x1xf32> to vector<2x1xf32>
    %7 = vector.shape_cast %4 : vector<2x1xf32> to vector<1x2x1xf32>
    tpu.vector_store %arg3[%c0_3, %c0_4, %c0_5], %7 {strides = array<i32>} : memref<1x2x1xf32, #tpu.memory_space<vmem>>, vector<1x2x1xf32>,
    %8 = arith.addf %0, %1 : vector<2x1024xf32>
    %cst_6 = arith.constant dense<0.000000e+00> : vector<2xf32>
    %9 = vector.multi_reduction <add>, %8, %cst_6 [1] : vector<2x1024xf32> to vector<2xf32>
    %10 = vector.shape_cast %9 : vector<2xf32> to vector<2x1xf32>
    %c0_7 = arith.constant 0 : index
    %c0_8 = arith.constant 0 : index
    %c0_9 = arith.constant 0 : index
    %11 = vector.load %arg4[%c0_7, %c0_8, %c0_9] : memref<1x2x1xf32, #tpu.memory_space<vmem>>, vector<1x2x1xf32>
    %12 = vector.shape_cast %11 : vector<1x2x1xf32> to vector<2x1xf32>
    %13 = vector.shape_cast %10 : vector<2x1xf32> to vector<1x2x1xf32>
    tpu.vector_store %arg4[%c0_7, %c0_8, %c0_9], %13 {strides = array<i32>} : memref<1x2x1xf32, #tpu.memory_space<vmem>>, vector<1x2x1xf32>,
    return
  }
  func.func @transform_0(%arg0: i32) -> (i32, i32) {
    %c0_i32 = arith.constant 0 : i32
    %c0_i32_0 = arith.constant 0 : i32
    return %c0_i32, %arg0 : i32, i32
  }
  func.func @transform_1(%arg0: i32) -> (i32, i32) {
    %c0_i32 = arith.constant 0 : i32
    %c0_i32_0 = arith.constant 0 : i32
    return %c0_i32, %arg0 : i32, i32
  }
  func.func @transform_2(%arg0: i32) -> (i32, i32, i32) {
    %c0_i32 = arith.constant 0 : i32
    %c0_i32_0 = arith.constant 0 : i32
    %c0_i32_1 = arith.constant 0 : i32
    return %arg0, %c0_i32, %c0_i32_0 : i32, i32, i32
  }
  func.func @transform_3(%arg0: i32) -> (i32, i32, i32) {
    %c0_i32 = arith.constant 0 : i32
    %c0_i32_0 = arith.constant 0 : i32
    %c0_i32_1 = arith.constant 0 : i32
    return %arg0, %c0_i32, %c0_i32_0 : i32, i32, i32
  }
}

</mosaic_0001>

<bundles_post_ra>
// kernel: tpu_custom_call.1
= control target key start
LH: loop header
LB: loop body
LE: loop exit
PB: predicated region body
PF: predicated region fallthrough
CT: control target
= control target key end

     0   :  { %9 = vsyncpa [#allocation3], 0  ;;  %s301_s0 = inlined_call_operand.hbm [shape: f32[2,1024], index: 0, kind: input, shape index: {}]   ;;  %s302_s1 = inlined_call_operand.hbm [shape: f32[2,1024], index: 1, kind: input, shape index: {}]   ;;  %s303_s2 = inlined_call_operand.vmem [shape: f32[1,2,1], index: 2, kind: output, shape index: {0}]   ;;  %s304_s3 = inlined_call_operand.vmem [shape: f32[1,2,1], index: 3, kind: output, shape index: {1}]  }
   0x1   :  { %10 = vsyncpa [#allocation5], 0  ;;  %s232_s12 = smov [#allocation2]   ;;  %s233_s14 = smov [#allocation4]  }
   0x2   :  { %s17_s13 = sshll.u32 %s232_s12, 4  ;;  %s27_s15 = sshll.u32 %s233_s14, 4  ;;  %s18_s13 = int_to_ptr.vmem [resolvable:$true] %s17_s13  ;;  %s28_s15 = int_to_ptr.vmem [resolvable:$true] %s27_s15 }
   0x3   :  { %s184_s18 = scalar_lea.hbm %s301_s0, 256 }
   0x4   :  { %p185_p0 = scmp.ne.s32.totalorder %s301_s0, %s184_s18  ;;  %p188_p1 = scmp.lt.u32.totalorder %s184_s18, %s301_s0 }
   0x6   :  { %p190_p2 = pnand %p188_p1, %p185_p0 }
   0x8   :  { %193 = shalt.err (!%p190_p2)
}
   0x9   :  { %s194_s23 = scalar_lea.vmem %s18_s13, 256  ;;  %p199_p4 = scmp.lt.s32.totalorder %s18_s13, %s18_s13 }
   0xa   :  { %p195_p3 = scmp.ne.s32.totalorder %s18_s13, %s194_s23  ;;  %p200_p5 = scmp.lt.s32.totalorder %s194_s23, %s194_s23 }
   0xc   :  { %p201_p6 = por %p200_p5, %p199_p4 }
   0xe   :  { %p202_p7 = pnand %p201_p6, %p195_p3 }
  0x10   :  { %205 = shalt.err (!%p202_p7)
}
  0x11   :  { %20 = dma.hbm_to_vmem [thread:$0]  %s301_s0, 256, %s18_s13, [#allocation3]  }
  0x12   :  { %s206_s28 = scalar_lea.hbm %s302_s1, 256 }
  0x13   :  { %p207_p8 = scmp.ne.s32.totalorder %s302_s1, %s206_s28  ;;  %p210_p9 = scmp.lt.u32.totalorder %s206_s28, %s302_s1 }
  0x15   :  { %p212_p10 = pnand %p210_p9, %p207_p8 }
  0x17   :  { %215 = shalt.err (!%p212_p10)
}
  0x18   :  { %s216_s6 = scalar_lea.vmem %s28_s15, 256  ;;  %p221_p12 = scmp.lt.s32.totalorder %s28_s15, %s28_s15 }
  0x19   :  { %p217_p11 = scmp.ne.s32.totalorder %s28_s15, %s216_s6  ;;  %p222_p13 = scmp.lt.s32.totalorder %s216_s6, %s216_s6 }
  0x1b   :  { %p223_p0 = por %p222_p13, %p221_p12 }
  0x1d   :  { %p224_p1 = pnand %p223_p0, %p217_p11 }
  0x1f   :  { %227 = shalt.err (!%p224_p1)
}
  0x20   :  { %30 = dma.hbm_to_vmem [thread:$0]  %s302_s1, 256, %s28_s15, [#allocation5]  }
  0x21   :  { %228 = dma.done.wait [#allocation3], 256  }
  0x22   :  { %229 = vsyncadd [#allocation3], 4294967040 }
  0x23   :  { %230 = dma.done.wait [#allocation5], 256  }
  0x24   :  { %231 = vsyncadd [#allocation5], 4294967040  ;;  %v49_v0 = vlaneseq  ;;  %v234_v1 = vmov 1983009808   ;;  %v37_v6 = vld [vmem:[#allocation2] sm:$0xff]  ;;  %v38_v7 = vld [vmem:[#allocation2 + $0x8] sm:$0xff] }
  0x25   :  { %v47_v2 = vunpack.c.l.s4 %v234_v1  ;;  %v39_v8 = vld [vmem:[#allocation4] sm:$0xff]  ;;  %v40_v9 = vld [vmem:[#allocation4 + $0x8] sm:$0xff]  ;;  %vm87_vm0 = vcmask 1041408   ;;  %vm105_vm1 = vcmask 1024  }
  0x26   :  { %v50_v3 = vshrl.u32 %v49_v0, 7  ;;  %v41_v10 = vmul.f32 %v39_v8, %v37_v6  ;;  %v107_v11 = vadd.f32 %v39_v8, %v37_v6  ;;  %v42_v12 = vmul.f32 %v40_v9, %v38_v7 }
  0x27   :  { %v48_v4 = vunpack.c.0.s8 %v47_v2  ;;  %v108_v19 = vadd.f32 %v40_v9, %v38_v7 }
  0x28   :  { %v45_v13 = vcombine.high %v41_v10, %v41_v10  ;;  %v111_v15 = vcombine.high %v107_v11, %v107_v11  ;;  %v62_v17 = vcombine.high %v42_v12, %v42_v12 }
  0x29   :  { %v51_v5 = vsub.s32 %v48_v4, %v50_v3  ;;  %v128_v30 = vcombine.high %v108_v19, %v108_v19 }
  0x2b   :  { %v52_v14 = vrot.slane %v41_v10, %v51_v5  ;;  %v118_v16 = vrot.slane %v107_v11, %v51_v5  ;;  %v69_v18 = vrot.slane %v42_v12, %v51_v5  ;;  %v59_v20 = vrot.slane %v45_v13, %v51_v5 }
  0x2c   :  { %v125_v23 = vrot.slane %v111_v15, %v51_v5  ;;  %v135_v31 = vrot.slane %v108_v19, %v51_v5  ;;  %v76_v32 = vrot.slane %v62_v17, %v51_v5  ;;  %v142_v42 = vrot.slane %v128_v30, %v51_v5 }
  0x2d   :  { %v60_v21 = vcombine.high %v52_v14, %v52_v14  ;;  %v88_v22 = vsel %vm87_vm0, %v52_v14, 0.0  ;;  %v126_v24 = vcombine.high %v118_v16, %v118_v16  ;;  %v61_v25 = vcombine.high %v59_v20, %v59_v20 }
  0x2e   :  { %v91_v27 = vsel %vm87_vm0, %v59_v20, 0.0  ;;  %v127_v29 = vcombine.high %v125_v23, %v125_v23  ;;  %v77_v33 = vcombine.high %v69_v18, %v69_v18  ;;  %v153_v35 = vsel %vm87_vm0, %v118_v16, 0.0 }
  0x2f   :  { %v89_v26 = vsel %vm87_vm0, %v60_v21, 0.0  ;;  %v93_v34 = vsel %vm87_vm0, %v61_v25, 0.0  ;;  %v154_v37 = vsel %vm87_vm0, %v126_v24, 0.0  ;;  %v156_v38 = vsel %vm87_vm0, %v125_v23, 0.0 }
  0x30   :  { %v90_v28 = vadd.f32 %v89_v26, %v88_v22  ;;  %v95_v39 = vsel %vm87_vm0, %v69_v18, 0.0  ;;  %v155_v40 = vadd.f32 %v154_v37, %v153_v35  ;;  %v143_v43 = vcombine.high %v135_v31, %v135_v31 }
  0x31   :  { %v158_v44 = vsel %vm87_vm0, %v127_v29, 0.0  ;;  %v78_v45 = vcombine.high %v76_v32, %v76_v32  ;;  %v97_v46 = vsel %vm87_vm0, %v77_v33, 0.0  ;;  %v160_v49 = vsel %vm87_vm0, %v135_v31, 0.0 }
  0x32   :  { %v92_v36 = vadd.f32 %v91_v27, %v90_v28  ;;  %v157_v47 = vadd.f32 %v156_v38, %v155_v40  ;;  %v99_v50 = vsel %vm87_vm0, %v76_v32, 0.0  ;;  %v144_v53 = vcombine.high %v142_v42, %v142_v42 }
  0x33   :  { %v162_v54 = vsel %vm87_vm0, %v143_v43, 0.0  ;;  %v101_v55 = vsel %vm87_vm0, %v78_v45, 0.0  ;;  %v164_v58 = vsel %vm87_vm0, %v142_v42, 0.0 }
  0x34   :  { %v94_v41 = vadd.f32 %v93_v34, %v92_v36  ;;  %v159_v51 = vadd.f32 %v158_v44, %v157_v47  ;;  %v166_v61 = vsel %vm87_vm0, %v144_v53, 0.0 }
  0x36   :  { %v96_v48 = vadd.f32 %v95_v39, %v94_v41  ;;  %v161_v56 = vadd.f32 %v160_v49, %v159_v51 }
  0x38   :  { %v98_v52 = vadd.f32 %v97_v46, %v96_v48  ;;  %v163_v59 = vadd.f32 %v162_v54, %v161_v56 }
  0x3a   :  { %v100_v57 = vadd.f32 %v99_v50, %v98_v52  ;;  %v165_v62 = vadd.f32 %v164_v58, %v163_v59 }
  0x3c   :  { %v102_v60 = vadd.f32 %v101_v55, %v100_v57  ;;  %v167_v63 = vadd.f32 %v166_v61, %v165_v62 }
  0x3e   :  { %103 = vadd.xlane.f32.xlu0 %v102_v60 }
  0x42   :  { %168 = vadd.xlane.f32.xlu0 %v167_v63 }
  0xcb   :  { %v104_v0 = vpop.xlane.xlu0 %103 }
  0xcc   :  { %106 = vst.msk [vmem:[%s303_s2] sm:$0x3] %vm105_vm1, %v104_v0 }
  0xcf   :  { %v169_v1 = vpop.xlane.xlu0 %168 }
  0xd0   :  { %170 = vst.msk [vmem:[%s304_s3] sm:$0x3] %vm105_vm1, %v169_v1 }
  0xd1   :  { %179 = vsyncpa [#allocation3], 1 }
  0xd2   :  { %180 = vsyncpa [#allocation5], 1 }

</bundles_post_ra>
